<compile_context>
chip_gen: v7x
topology: tpu7x:2x2x1
jax: 0.10.0
libtpu: 0.0.40
codegen_flags: <defaults>
</compile_context>

<pallas_src>
import functools

import jax
import jax.numpy as jnp
from jax.experimental import pallas as pl
from jax.experimental.pallas import tpu as pltpu


def _round_up(x, m):
    return ((x + m - 1) // m) * m


def _cdiv(a, b):
    return (a + b - 1) // b


def _puremf_kernel(u_ref, i_ref, o_ref, *, d, p):
    """u_ref/i_ref: (tr, p*d) lane-packed embedding tiles; o_ref: (tr, p)."""
    prod = u_ref[...].astype(jnp.float32) * i_ref[...].astype(jnp.float32)
    if p == 1:
        scores = jnp.sum(prod, axis=-1, keepdims=True)                  # (tr, 1)
    else:
        # Segment-sum each d-wide lane group with a tiny block-diagonal matmul
        # on the (otherwise idle) MXU: sel[k, j] = 1 iff j*d <= k < (j+1)*d.
        w = p * d
        k = jax.lax.broadcasted_iota(jnp.int32, (w, p), 0)
        j = jax.lax.broadcasted_iota(jnp.int32, (w, p), 1)
        sel = jnp.where((k >= j * d) & (k < (j + 1) * d), 1.0, 0.0)
        sel = sel.astype(jnp.float32)
        scores = jnp.dot(prod, sel, preferred_element_type=jnp.float32)  # (tr, p)
    o_ref[...] = jax.nn.sigmoid(scores).astype(o_ref.dtype)


def _choose_tiling(b, d, max_tb):
    """Pick (batch_tile, padded_batch), both multiples of 128."""
    b128 = _round_up(max(b, 1), 128)
    # VMEM-aware cap: keep each input block around <= 3 MiB (x2 inputs x2 bufs
    # plus the small output stays well under the default 32 MiB scoped VMEM).
    vmem_rows = max(128, ((3 << 20) // (d * 4)) // 128 * 128)
    cap = max(128, min(max_tb, vmem_rows))
    n_tiles = _cdiv(b128, cap)
    if b128 >= 256:
        # v7x: keep >= 2 "parallel" grid steps so both TensorCores get work.
        n_tiles = max(n_tiles, 2)
    tb = _round_up(_cdiv(b128, n_tiles), 128)
    b_pad = _round_up(b128, tb)
    return tb, b_pad


@functools.partial(jax.jit, static_argnames=("max_tb",))
def puremf_forward(user_table, item_table, users, items, *, max_tb=8192):
    """PureMF.forward: sigmoid(sum(user_emb * item_emb, axis=1)).

    user_table: (num_users, D); item_table: (num_items, D) (f32 or bf16)
    users, items: (B,) int32 indices
    returns: (B,) float32
    """
    B = users.shape[0]
    D = user_table.shape[1]
    if B == 0:
        return jnp.zeros((0,), jnp.float32)

    # Lane-packing factor: put P consecutive batch rows side by side on the
    # 128-lane axis (P is a power of two, so tile rows stay multiples of 8).
    P = min(16, 128 // D) if (D <= 128 and 128 % D == 0) else 1
    W = P * D

    tb, B_pad = _choose_tiling(B, D, max_tb)
    grid = B_pad // tb
    tr = tb // P  # rows per kernel tile after packing

    # Pad index vectors (index 0 is always valid); padded results are sliced
    # off at the end.
    users_pad = jnp.pad(users, (0, B_pad - B))
    items_pad = jnp.pad(items, (0, B_pad - B))

    # XLA glue: embedding-row gather, then a *free* row-major reshape so the
    # kernel sees lane-dense (rows, P*D) tiles.  No transpose, no extra pass.
    ue = user_table[users_pad].reshape(B_pad // P, W)
    ie = item_table[items_pad].reshape(B_pad // P, W)

    u_bytes = jnp.dtype(user_table.dtype).itemsize
    i_bytes = jnp.dtype(item_table.dtype).itemsize
    cost = pl.CostEstimate(
        flops=4 * B_pad * D,                  # elementwise mul + segment matmul
        transcendentals=B_pad,                # sigmoid
        bytes_accessed=B_pad * D * (u_bytes + i_bytes) + B_pad * 4,
    )

    kernel = functools.partial(_puremf_kernel, d=D, p=P)
    out = pl.pallas_call(
        kernel,
        out_shape=jax.ShapeDtypeStruct((B_pad // P, P), jnp.float32),
        grid_spec=pltpu.PrefetchScalarGridSpec(
            num_scalar_prefetch=0,
            grid=(grid,),
            in_specs=[
                pl.BlockSpec((tr, W), lambda b: (b, 0)),
                pl.BlockSpec((tr, W), lambda b: (b, 0)),
            ],
            out_specs=pl.BlockSpec((tr, P), lambda b: (b, 0)),
        ),
        compiler_params=pltpu.CompilerParams(
            dimension_semantics=("parallel",)),
        cost_estimate=cost,
    )(ue, ie)

    return out.reshape(B_pad)[:B]


def puremf_forward_ref(user_table, item_table, users, items):
    ue = user_table[users]
    ie = item_table[items]
    return jax.nn.sigmoid(jnp.sum(ue * ie, axis=1))


if __name__ == "__main__":
    # Small synthetic config consistent with PureMF.__init__ (N(0,1) init).
    num_users, num_items, latent_dim = 64, 48, 32

    key = jax.random.PRNGKey(0)
    k_u, k_i = jax.random.split(key)
    user_table = jax.random.normal(k_u, (num_users, latent_dim), jnp.float32)
    item_table = jax.random.normal(k_i, (num_items, latent_dim), jnp.float32)

    def check(batch, max_tb, seed):
        ku, ki = jax.random.split(jax.random.PRNGKey(seed))
        users = jax.random.randint(ku, (batch,), 0, num_users, jnp.int32)
        items = jax.random.randint(ki, (batch,), 0, num_items, jnp.int32)
        out = jax.block_until_ready(
            puremf_forward(user_table, item_table, users, items, max_tb=max_tb))
        ref = puremf_forward_ref(user_table, item_table, users, items)
        assert out.shape == (batch,), out.shape
        assert jnp.allclose(out, ref, atol=1e-5, rtol=1e-5), (out, ref)

    check(10, 8192, 1)     # tiny batch, padding, single tile
    check(300, 128, 2)     # forced multi-tile grid (3 steps of 128)
    check(333, 8192, 3)    # default tiling: >=2 parallel steps, uneven pad

    # Fallback path (latent dim that does not divide 128 -> no lane packing).
    d2 = 48
    ut2 = jax.random.normal(jax.random.PRNGKey(10), (num_users, d2), jnp.float32)
    it2 = jax.random.normal(jax.random.PRNGKey(11), (num_items, d2), jnp.float32)
    ku, ki = jax.random.split(jax.random.PRNGKey(4))
    users = jax.random.randint(ku, (20,), 0, num_users, jnp.int32)
    items = jax.random.randint(ki, (20,), 0, num_items, jnp.int32)
    out = jax.block_until_ready(puremf_forward(ut2, it2, users, items))
    ref = puremf_forward_ref(ut2, it2, users, items)
    assert out.shape == (20,)
    assert jnp.allclose(out, ref, atol=1e-5, rtol=1e-5), (out, ref)

    print("KERNEL_OK")
</pallas_src>

<mosaic_0001>
module attributes {stable_mosaic.version = 11 : i64} {
  func.func @_puremf_kernel(%arg0: i32, %arg1: memref<32x128xf32, #tpu.memory_space<vmem>>, %arg2: memref<32x128xf32, #tpu.memory_space<vmem>>, %arg3: memref<32x4xf32, #tpu.memory_space<vmem>>) attributes {dimension_semantics = [#tpu.dimension_semantics<parallel>], iteration_bounds = array<i64: 1>, scalar_prefetch = 0 : i64, scratch_operands = 0 : i64, tpu.core_type = #tpu.core_type<tc>, window_params = [{transform_indices = @transform_0, window_bounds = array<i64: 32, 128>}, {transform_indices = @transform_1, window_bounds = array<i64: 32, 128>}, {transform_indices = @transform_2, window_bounds = array<i64: 32, 4>}]} {
    %c0 = arith.constant 0 : index
    %c0_0 = arith.constant 0 : index
    %0 = vector.load %arg1[%c0, %c0_0] : memref<32x128xf32, #tpu.memory_space<vmem>>, vector<32x128xf32>
    %c0_1 = arith.constant 0 : index
    %c0_2 = arith.constant 0 : index
    %1 = vector.load %arg2[%c0_1, %c0_2] : memref<32x128xf32, #tpu.memory_space<vmem>>, vector<32x128xf32>
    %2 = arith.mulf %0, %1 : vector<32x128xf32>
    %3 = tpu.iota {dimensions = array<i32: 0>} : vector<128x4xi32>
    %4 = tpu.iota {dimensions = array<i32: 1>} : vector<128x4xi32>
    %c32_i32 = arith.constant 32 : i32
    %5 = vector.broadcast %c32_i32 : i32 to vector<128x4xi32>
    %6 = arith.muli %4, %5 : vector<128x4xi32>
    %7 = arith.cmpi sge, %3, %6 : vector<128x4xi32>
    %c1_i32 = arith.constant 1 : i32
    %8 = vector.broadcast %c1_i32 : i32 to vector<128x4xi32>
    %9 = arith.addi %4, %8 : vector<128x4xi32>
    %c32_i32_3 = arith.constant 32 : i32
    %10 = vector.broadcast %c32_i32_3 : i32 to vector<128x4xi32>
    %11 = arith.muli %9, %10 : vector<128x4xi32>
    %12 = arith.cmpi slt, %3, %11 : vector<128x4xi32>
    %13 = arith.andi %7, %12 : vector<128x4xi1>
    %cst = arith.constant 1.000000e+00 : f32
    %cst_4 = arith.constant 0.000000e+00 : f32
    %14 = vector.broadcast %cst : f32 to vector<128x4xf32>
    %15 = vector.broadcast %cst_4 : f32 to vector<128x4xf32>
    %16 = arith.select %13, %14, %15 : vector<128x4xi1>, vector<128x4xf32>
    %cst_5 = arith.constant dense<0.000000e+00> : vector<32x4xf32>
    %17 = tpu.matmul %2, %16, %cst_5 {dimension_numbers = #tpu.dot_dimension_numbers<[1], [0], [0], [1], [0, 0, 1, 1], [], []>} : vector<32x128xf32>, vector<128x4xf32>, vector<32x4xf32> -> vector<32x4xf32>
    %18 = arith.negf %17 : vector<32x4xf32>
    %19 = math.exp %18 : vector<32x4xf32>
    %cst_6 = arith.constant 1.000000e+00 : f32
    %20 = vector.broadcast %cst_6 : f32 to vector<32x4xf32>
    %21 = arith.addf %20, %19 : vector<32x4xf32>
    %22 = arith.divf %20, %21 : vector<32x4xf32>
    %c0_7 = arith.constant 0 : index
    %c0_8 = arith.constant 0 : index
    %23 = vector.load %arg3[%c0_7, %c0_8] : memref<32x4xf32, #tpu.memory_space<vmem>>, vector<32x4xf32>
    tpu.vector_store %arg3[%c0_7, %c0_8], %22 {strides = array<i32>} : memref<32x4xf32, #tpu.memory_space<vmem>>, vector<32x4xf32>,
    return
  }
  func.func @transform_0(%arg0: i32) -> (i32, i32) {
    %c0_i32 = arith.constant 0 : i32
    %c0_i32_0 = arith.constant 0 : i32
    return %arg0, %c0_i32 : i32, i32
  }
  func.func @transform_1(%arg0: i32) -> (i32, i32) {
    %c0_i32 = arith.constant 0 : i32
    %c0_i32_0 = arith.constant 0 : i32
    return %arg0, %c0_i32 : i32, i32
  }
  func.func @transform_2(%arg0: i32) -> (i32, i32) {
    %c0_i32 = arith.constant 0 : i32
    %c0_i32_0 = arith.constant 0 : i32
    return %arg0, %c0_i32 : i32, i32
  }
}

</mosaic_0001>

<bundles_post_ra>
// kernel: puremf_forward.1
= control target key start
LH: loop header
LB: loop body
LE: loop exit
PB: predicated region body
PF: predicated region fallthrough
CT: control target
= control target key end

     0   :  { %v23_v0 = vlaneseq  ;;  %v370_v18 = vmov 1.0|1.0   ;;  %s533_s0 = inlined_call_operand.vmem [shape: f32[32,128], index: 0, kind: input, shape index: {}]   ;;  %s534_s1 = inlined_call_operand.vmem [shape: f32[32,128], index: 1, kind: input, shape index: {}]   ;;  %s535_s2 = inlined_call_operand.vmem [shape: f32[32,4], index: 2, kind: output, shape index: {}]  }
   0x1   :  { %v11_v1 = vld [vmem:[%s533_s0] sm:$0xff]  ;;  %v13_v3 = vld [vmem:[%s533_s0 + $0x10] sm:$0xff]  ;;  %v12_v30 = vld [vmem:[%s533_s0 + $0x8] sm:$0xff] }
   0x2   :  { %v15_v2 = vld [vmem:[%s534_s1] sm:$0xff]  ;;  %v395_v4 = vshrl.u32 %v23_v0, 7  ;;  %v41_v5 = vand.u32 127, %v23_v0  ;;  %v17_v7 = vld [vmem:[%s534_s1 + $0x10] sm:$0xff]  ;;  %v16_v31 = vld [vmem:[%s534_s1 + $0x8] sm:$0xff] }
   0x3   :  { %v19_v6 = vmul.f32 %v15_v2, %v11_v1  ;;  %v21_v8 = vmul.f32 %v17_v7, %v13_v3  ;;  %v14_v32 = vld [vmem:[%s533_s0 + $0x18] sm:$0xff]  ;;  %v20_v34 = vmul.f32 %v16_v31, %v12_v30 }
   0x4   :  { %v25_v9 = vadd.s32 8, %v395_v4  ;;  %v401_v10 = vmul.u32 32, %v41_v5  ;;  %v59_v11 = vadd.s32 1, %v41_v5  ;;  %v26_v12 = vadd.s32 16, %v395_v4  ;;  %v18_v33 = vld [vmem:[%s534_s1 + $0x18] sm:$0xff] }
   0x5   :  { %299 = vmatprep.mubr.f32.mxu0 %v19_v6  ;;  %302 = vmatprep.mubr.f32.mxu1 %v21_v8  ;;  %v27_v14 = vadd.s32 24, %v395_v4  ;;  %v28_v15 = vadd.s32 32, %v395_v4  ;;  %v29_v16 = vadd.s32 40, %v395_v4  ;;  %v30_v17 = vadd.s32 48, %v395_v4 }
   0x6   :  { %vm43_vm0 = vcmp.ge.s32.totalorder %v395_v4, %v401_v10  ;;  %v406_v13 = vmul.u32 32, %v59_v11  ;;  %vm44_vm1 = vcmp.ge.s32.totalorder %v25_v9, %v401_v10  ;;  %vm45_vm5 = vcmp.ge.s32.totalorder %v26_v12, %v401_v10 }
   0x7   :  { %vm46_vm8 = vcmp.ge.s32.totalorder %v27_v14, %v401_v10  ;;  %vm47_vm12 = vcmp.ge.s32.totalorder %v28_v15, %v401_v10  ;;  %v31_v19 = vadd.s32 56, %v395_v4  ;;  %vm48_vm15 = vcmp.ge.s32.totalorder %v29_v16, %v401_v10 }
   0x8   :  { %vm61_vm2 = vcmp.lt.s32.totalorder %v395_v4, %v406_v13  ;;  %vm62_vm3 = vcmp.lt.s32.totalorder %v25_v9, %v406_v13  ;;  %vm63_vm6 = vcmp.lt.s32.totalorder %v26_v12, %v406_v13  ;;  %vm64_vm9 = vcmp.lt.s32.totalorder %v27_v14, %v406_v13 }
   0x9   :  { %vm77_vm4 = vmand %vm43_vm0, %vm61_vm2  ;;  %vm65_vm13 = vcmp.lt.s32.totalorder %v28_v15, %v406_v13  ;;  %vm66_vm0 = vcmp.lt.s32.totalorder %v29_v16, %v406_v13  ;;  %v32_v20 = vadd.s32 64, %v395_v4  ;;  %v33_v21 = vadd.s32 72, %v395_v4 }
   0xa   :  { %vm78_vm7 = vmand %vm44_vm1, %vm62_vm3  ;;  %vm49_vm3 = vcmp.ge.s32.totalorder %v30_v17, %v401_v10  ;;  %v34_v22 = vadd.s32 80, %v395_v4  ;;  %v35_v23 = vadd.s32 88, %v395_v4  ;;  %v36_v25 = vadd.s32 96, %v395_v4 }
   0xb   :  { %vm305_vm10 = vmpackc.low %vm78_vm7, %vm77_vm4  ;;  %vm67_vm4 = vcmp.lt.s32.totalorder %v30_v17, %v406_v13  ;;  %vm68_vm7 = vcmp.lt.s32.totalorder %v31_v19, %v406_v13  ;;  %v37_v26 = vadd.s32 104, %v395_v4  ;;  %v38_v28 = vadd.s32 112, %v395_v4 }
   0xc   :  { %306 = vmatprep.subr.msk.bf16.mxu0 %vm305_vm10, %v370_v18  ;;  %337 = vmatprep.subr.msk.bf16.mxu1 %vm305_vm10, %v370_v18  ;;  %vm79_vm11 = vmand %vm45_vm5, %vm63_vm6  ;;  %vm50_vm6 = vcmp.ge.s32.totalorder %v31_v19, %v401_v10  ;;  %v39_v29 = vadd.s32 120, %v395_v4  ;;  %v22_v35 = vmul.f32 %v18_v33, %v14_v32 }
   0xd   :  { %308 = vmatpush3.bf16.msk.msra.mxu0 %vm305_vm10, %v370_v18  ;;  %345 = vmatpush3.bf16.msk.msra.mxu1 %vm305_vm10, %v370_v18  ;;  %vm80_vm14 = vmand %vm46_vm8, %vm64_vm9  ;;  %vm51_vm10 = vcmp.ge.s32.totalorder %v32_v20, %v401_v10 }
   0xe   :  { %vm309_vm1 = vmpackc.low %vm80_vm14, %vm79_vm11  ;;  %vm69_vm11 = vcmp.lt.s32.totalorder %v32_v20, %v406_v13  ;;  %vm70_vm14 = vcmp.lt.s32.totalorder %v33_v21, %v406_v13 }
   0xf   :  { %310 = vmatprep.subr.msk.bf16.mxu0 %vm309_vm1, %v370_v18  ;;  %338 = vmatprep.subr.msk.bf16.mxu1 %vm309_vm1, %v370_v18  ;;  %vm81_vm2 = vmand %vm47_vm12, %vm65_vm13  ;;  %vm52_vm13 = vcmp.ge.s32.totalorder %v33_v21, %v401_v10 }
  0x10   :  { %vm82_vm5 = vmand %vm48_vm15, %vm66_vm0 }
  0x11   :  { %312 = vmatpush3.bf16.msk.msra.mxu0 %vm309_vm1, %v370_v18  ;;  %346 = vmatpush3.bf16.msk.msra.mxu1 %vm309_vm1, %v370_v18  ;;  %vm313_vm8 = vmpackc.low %vm82_vm5, %vm81_vm2  ;;  %vm53_vm1 = vcmp.ge.s32.totalorder %v34_v22, %v401_v10  ;;  %vm71_vm2 = vcmp.lt.s32.totalorder %v34_v22, %v406_v13  ;;  %vm72_vm5 = vcmp.lt.s32.totalorder %v35_v23, %v406_v13 }
  0x12   :  { %314 = vmatprep.subr.msk.bf16.mxu0 %vm313_vm8, %v370_v18  ;;  %339 = vmatprep.subr.msk.bf16.mxu1 %vm313_vm8, %v370_v18  ;;  %vm83_vm9 = vmand %vm49_vm3, %vm67_vm4  ;;  %vm54_vm4 = vcmp.ge.s32.totalorder %v35_v23, %v401_v10 }
  0x13   :  { %vm84_vm12 = vmand %vm50_vm6, %vm68_vm7 }
  0x14   :  { %vm447_vm15 = vmpackc.low %vm84_vm12, %vm83_vm9  ;;  %vm73_vm9 = vcmp.lt.s32.totalorder %v36_v25, %v406_v13  ;;  %vm74_vm12 = vcmp.lt.s32.totalorder %v37_v26, %v406_v13 }
  0x15   :  { %316 = vmatpush3.bf16.msk.msra.mxu0 %vm313_vm8, %v370_v18  ;;  %347 = vmatpush3.bf16.msk.msra.mxu1 %vm313_vm8, %v370_v18  ;;  %vm85_vm0 = vmand %vm51_vm10, %vm69_vm11  ;;  %vm55_vm8 = vcmp.ge.s32.totalorder %v36_v25, %v401_v10  ;;  %vm56_vm11 = vcmp.ge.s32.totalorder %v37_v26, %v401_v10 }
  0x16   :  { %318 = vmatprep.subr.msk.bf16.mxu0 %vm447_vm15, %v370_v18  ;;  %340 = vmatprep.subr.msk.bf16.mxu1 %vm447_vm15, %v370_v18  ;;  %vm86_vm3 = vmand %vm52_vm13, %vm70_vm14 }
  0x17   :  { %vm465_vm6 = vmpackc.low %vm86_vm3, %vm85_vm0  ;;  %vm76_vm3 = vcmp.lt.s32.totalorder %v39_v29, %v406_v13 }
  0x18   :  { %vm87_vm7 = vmand %vm53_vm1, %vm71_vm2  ;;  %vm75_vm1 = vcmp.lt.s32.totalorder %v38_v28, %v406_v13  ;;  %vm58_vm2 = vcmp.ge.s32.totalorder %v39_v29, %v401_v10 }
  0x19   :  { %320 = vmatpush3.bf16.msk.msra.mxu0 %vm447_vm15, %v370_v18  ;;  %348 = vmatpush3.bf16.msk.msra.mxu1 %vm447_vm15, %v370_v18  ;;  %vm88_vm10 = vmand %vm54_vm4, %vm72_vm5  ;;  %vm57_vm15 = vcmp.ge.s32.totalorder %v38_v28, %v401_v10 }
  0x1a   :  { %322 = vmatprep.subr.msk.bf16.mxu0 %vm465_vm6, %v370_v18  ;;  %341 = vmatprep.subr.msk.bf16.mxu1 %vm465_vm6, %v370_v18  ;;  %vm325_vm13 = vmpackc.low %vm88_vm10, %vm87_vm7 }
  0x1b   :  { %vm89_vm14 = vmand %vm55_vm8, %vm73_vm9  ;;  %vm218_vm8 = vcmask 31744  }
  0x1c   :  { %vm90_vm0 = vmand %vm56_vm11, %vm74_vm12 }
  0x1d   :  { %324 = vmatpush3.bf16.msk.msra.mxu0 %vm465_vm6, %v370_v18  ;;  %349 = vmatpush3.bf16.msk.msra.mxu1 %vm465_vm6, %v370_v18  ;;  %vm329_vm4 = vmpackc.low %vm90_vm0, %vm89_vm14 }
  0x1e   :  { %326 = vmatprep.subr.msk.bf16.mxu0 %vm325_vm13, %v370_v18  ;;  %342 = vmatprep.subr.msk.bf16.mxu1 %vm325_vm13, %v370_v18  ;;  %vm91_vm5 = vmand %vm57_vm15, %vm75_vm1 }
  0x1f   :  { %vm92_vm7 = vmand %vm58_vm2, %vm76_vm3 }
  0x20   :  { %vm333_vm6 = vmpackc.low %vm92_vm7, %vm91_vm5 }
  0x21   :  { %328 = vmatpush3.bf16.msk.msra.mxu0 %vm325_vm13, %v370_v18  ;;  %350 = vmatpush3.bf16.msk.msra.mxu1 %vm325_vm13, %v370_v18 }
  0x22   :  { %330 = vmatprep.subr.msk.bf16.mxu0 %vm329_vm4, %v370_v18  ;;  %343 = vmatprep.subr.msk.bf16.mxu1 %vm329_vm4, %v370_v18 }
  0x25   :  { %332 = vmatpush3.bf16.msk.msra.mxu0 %vm329_vm4, %v370_v18  ;;  %351 = vmatpush3.bf16.msk.msra.mxu1 %vm329_vm4, %v370_v18 }
  0x26   :  { %334 = vmatprep.subr.msk.bf16.mxu0 %vm333_vm6, %v370_v18  ;;  %344 = vmatprep.subr.msk.bf16.mxu1 %vm333_vm6, %v370_v18 }
  0x29   :  { %336 = vmatpush3.bf16.msk.msra.mxu0 %vm333_vm6, %v370_v18  ;;  %352 = vmatpush3.bf16.msk.msra.mxu1 %vm333_vm6, %v370_v18 }
  0x2c   :  { %300 = vmatmul.mubr.f32.vlgmr.msra.gmra.mrb[0].mxu0 %v20_v34  ;;  %303 = vmatmul.mubr.f32.vlgmr.msra.gmra.mrb[0].mxu1 %v22_v35 }
  0xff   :  { %v301_v36 = vpop.f32.mrb[0].mxu0  ;;  %v304_v37 = vpop.f32.mrb[0].mxu1 }
 0x100   :  { %v244_v38 = vmul.f32 -1.442695, %v301_v36  ;;  %v246_v39 = vmul.f32 -1.442695, %v304_v37  ;;  %v175_v40 = vpop.f32.mrb[1].mxu0  ;;  %v185_v41 = vpop.f32.mrb[1].mxu1 }
 0x101   :  { %v243_v42 = vmul.f32 -1.442695, %v175_v40  ;;  %v245_v43 = vmul.f32 -1.442695, %v185_v41 }
 0x102   :  { %354 = vpow2.f32 %v244_v38 }
 0x103   :  { %356 = vpow2.f32 %v246_v39 }
 0x104   :  { %358 = vpow2.f32 %v243_v42 }
 0x105   :  { %360 = vpow2.f32 %v245_v43 }
 0x10c   :  { %v355_v44 = vpop.eup %354 }
 0x10d   :  { %v357_v45 = vpop.eup %356  ;;  %v207_v46 = vadd.f32 1.0, %v355_v44 }
 0x10e   :  { %v359_v47 = vpop.eup %358  ;;  %v209_v48 = vadd.f32 1.0, %v357_v45 }
 0x10f   :  { %v361_v49 = vpop.eup %360  ;;  %362 = vrcp.f32 %v207_v46  ;;  %v206_v50 = vadd.f32 1.0, %v359_v47 }
 0x110   :  { %364 = vrcp.f32 %v209_v48  ;;  %v208_v51 = vadd.f32 1.0, %v361_v49 }
 0x111   :  { %366 = vrcp.f32 %v206_v50 }
 0x112   :  { %368 = vrcp.f32 %v208_v51 }
 0x119   :  { %v363_v52 = vpop.eup %362 }
 0x11a   :  { %v365_v53 = vpop.eup %364  ;;  %220 = vst.msk [vmem:[%s535_s2 + $0x8] sm:$0xff] %vm218_vm8, %v363_v52 }
 0x11b   :  { %v367_v54 = vpop.eup %366  ;;  %222 = vst.msk [vmem:[%s535_s2 + $0x18] sm:$0xff] %vm218_vm8, %v365_v53 }
 0x11c   :  { %v369_v55 = vpop.eup %368  ;;  %219 = vst.msk [vmem:[%s535_s2] sm:$0xff] %vm218_vm8, %v367_v54 }
 0x11d   :  { %221 = vst.msk [vmem:[%s535_s2 + $0x10] sm:$0xff] %vm218_vm8, %v369_v55 }

</bundles_post_ra>
